<compile_context>
chip_gen: v7x
topology: tpu7x:2x2x1
jax: 0.10.0
libtpu: 0.0.40
codegen_flags: <defaults>
</compile_context>

<pallas_src>
import jax
import jax.numpy as jnp
from jax.experimental import pallas as pl
from jax.experimental.pallas import tpu as pltpu

LANE = 128
MAX_WIDTH = 8192                      # widest lane-dense slab width considered
TILE_BYTES = 6 * 1024 * 1024          # target payload per grid step (per buffer)
MIN_TILE_BYTES = 512 * 1024           # never shrink a block below this payload
MIN_STEPS = 8                         # >= 2-4 blocks per TC on 2-TC (v7x) parts
VMEM_LIMIT_BYTES = 32 * 1024 * 1024   # 2 in + 2 out buffered 6 MiB copies + slack


def _qsilu_kernel(x_ref, o_ref):
    # HBM-bound: the f32 upcast is free (VPU/EUP slack, VMEM tiles stay in the
    # Ref dtype) and matches the f32 / PyTorch reference more closely than
    # bf16-native exp.
    v = x_ref[...].astype(jnp.float32)
    o_ref[...] = (v * jax.nn.sigmoid(v)).astype(o_ref.dtype)


def _sublane_multiple(itemsize: int) -> int:
    # dtype-native second-minor packing: 8 rows (f32), 16 (bf16), 32 (int8/fp8)
    return 8 * max(1, 4 // itemsize)


def _choose_width(n: int):
    """Widest multiple-of-128 slab width dividing n exactly (no pad, no slice)."""
    for w in range(MAX_WIDTH, LANE - 1, -LANE):
        if n % w == 0:
            return w, 0
    return LANE, (-n) % LANE  # rare fallback: pad to a single lane-width only


def _choose_block_rows(rows: int, width: int, itemsize: int,
                       tile_bytes: int, min_tile_bytes: int) -> int:
    sub = _sublane_multiple(itemsize)
    bytes_per_row = width * itemsize

    def rows_for(nbytes):  # rows fitting in nbytes, rounded DOWN to sub
        return max(sub, (nbytes // bytes_per_row) // sub * sub)

    def round_up(r):       # rounded UP to sub
        return -(-r // sub) * sub

    cap_rows = rows_for(tile_bytes)                 # VMEM-driven maximum
    floor_rows = rows_for(min_tile_bytes)           # overhead-driven minimum
    steps_rows = round_up(-(-rows // MIN_STEPS))    # aim for >= MIN_STEPS blocks

    block_rows = max(floor_rows, min(cap_rows, steps_rows))
    # Small inputs: one full-extent block (full array dim is always legal).
    return min(block_rows, rows)


def qsilu(x: jax.Array, *, donate_input: bool = False, _tile_bytes=None) -> jax.Array:
    """Split-Quaternion SiLU — semantically identical to elementwise SiLU."""
    orig_shape = x.shape
    orig_dtype = x.dtype
    n = x.size
    itemsize = jnp.dtype(orig_dtype).itemsize

    tile_bytes = TILE_BYTES if _tile_bytes is None else _tile_bytes
    min_tile_bytes = MIN_TILE_BYTES if _tile_bytes is None else max(1, _tile_bytes // 4)

    width, pad = _choose_width(n)
    flat = x.reshape(-1)
    if pad:
        # Rare path (no multiple-of-128 divisor of n).  SiLU(0)=0 and the
        # padded tail is sliced off, so zero padding is safe.  The pad itself
        # folds into the input DMA via allow_input_fusion.
        flat = jnp.pad(flat, (0, pad))
    rows = (n + pad) // width
    x2d = flat.reshape(rows, width)

    block_rows = _choose_block_rows(rows, width, itemsize, tile_bytes, min_tile_bytes)
    grid = (pl.cdiv(rows, block_rows),)  # ragged final block is masked by Pallas

    out2d = pl.pallas_call(
        _qsilu_kernel,
        out_shape=jax.ShapeDtypeStruct((rows, width), orig_dtype),
        grid_spec=pltpu.PrefetchScalarGridSpec(
            num_scalar_prefetch=0,
            grid=grid,
            in_specs=[pl.BlockSpec((block_rows, width), lambda i: (i, 0))],
            out_specs=pl.BlockSpec((block_rows, width), lambda i: (i, 0)),
        ),
        compiler_params=pltpu.CompilerParams(
            dimension_semantics=("parallel",),  # shard grid across TCs (v7x megacore)
            allow_input_fusion=[True],          # fold wrapper reshape/pad into input DMA
            vmem_limit_bytes=VMEM_LIMIT_BYTES,
        ),
        input_output_aliases=({0: 0} if donate_input else {}),
    )(x2d)

    if pad:
        # TODO(synk): the output slice on this rare ragged path is one extra
        # full-tensor HBM copy; acceptable since the path is now rare.
        return out2d.reshape(-1)[:n].reshape(orig_shape)
    return out2d.reshape(orig_shape)


def qsilu_ref(x: jax.Array) -> jax.Array:
    """Pure-JAX reference mirroring the PyTorch forward exactly."""
    out = jnp.zeros_like(x)
    imag_parts = x[:, :, 0:, :, :]
    out = out.at[:, :, 0:, :, :].set(imag_parts * jax.nn.sigmoid(imag_parts))
    return out


if __name__ == "__main__":
    key = jax.random.PRNGKey(0)
    k1, k2, k3 = jax.random.split(key, 3)

    # (B, C, Q, H, W): batch=2, channels=4, quaternion components=4, spatial=8x8
    x = jax.random.normal(k1, (2, 4, 4, 8, 8), dtype=jnp.float32)
    out = qsilu(x)
    jax.block_until_ready(out)
    ref = qsilu_ref(x)
    assert out.shape == ref.shape and out.dtype == ref.dtype
    assert jnp.allclose(out, ref, atol=1e-6, rtol=1e-6), "mismatch vs reference"

    # Odd-sized tensor exercises the (rare) pad-to-lane fallback path.
    x2 = jax.random.normal(k2, (1, 3, 4, 5, 7), dtype=jnp.float32)
    out2 = qsilu(x2)
    jax.block_until_ready(out2)
    assert jnp.allclose(out2, qsilu_ref(x2), atol=1e-6, rtol=1e-6), \
        "mismatch vs reference (ragged/pad path)"

    # bf16, multi-block grid with a ragged (masked) final block: the block-size
    # override forces several grid steps so the pipelined path is exercised
    # cheaply at a small shape.
    x3 = jax.random.normal(k3, (2, 8, 4, 48, 104), dtype=jnp.bfloat16)
    out3 = qsilu(x3, _tile_bytes=96 * 1024)
    jax.block_until_ready(out3)
    x3f = x3.astype(jnp.float32)
    ref3 = (x3f * jax.nn.sigmoid(x3f)).astype(jnp.bfloat16)
    assert out3.shape == x3.shape and out3.dtype == x3.dtype
    assert jnp.allclose(out3.astype(jnp.float32), ref3.astype(jnp.float32),
                        atol=2e-2, rtol=2e-2), "mismatch vs reference (bf16 multi-block)"

    print("KERNEL_OK")
</pallas_src>

<mosaic_0001>
module attributes {stable_mosaic.version = 11 : i64} {
  func.func @_qsilu_kernel(%arg0: i32, %arg1: memref<1x2048xf32, #tpu.memory_space<vmem>>, %arg2: memref<1x2048xf32, #tpu.memory_space<vmem>>) attributes {dimension_semantics = [#tpu.dimension_semantics<parallel>], iteration_bounds = array<i64: 1>, scalar_prefetch = 0 : i64, scratch_operands = 0 : i64, tpu.core_type = #tpu.core_type<tc>, window_params = [{transform_indices = @transform_0, window_bounds = array<i64: 1, 2048>}, {transform_indices = @transform_1, window_bounds = array<i64: 1, 2048>}]} {
    %c0 = arith.constant 0 : index
    %c0_0 = arith.constant 0 : index
    %0 = vector.load %arg1[%c0, %c0_0] : memref<1x2048xf32, #tpu.memory_space<vmem>>, vector<1x2048xf32>
    %1 = arith.negf %0 : vector<1x2048xf32>
    %2 = math.exp %1 : vector<1x2048xf32>
    %cst = arith.constant 1.000000e+00 : f32
    %3 = vector.broadcast %cst : f32 to vector<1x2048xf32>
    %4 = arith.addf %3, %2 : vector<1x2048xf32>
    %5 = arith.divf %3, %4 : vector<1x2048xf32>
    %6 = arith.mulf %0, %5 : vector<1x2048xf32>
    %c0_1 = arith.constant 0 : index
    %c0_2 = arith.constant 0 : index
    %7 = vector.load %arg2[%c0_1, %c0_2] : memref<1x2048xf32, #tpu.memory_space<vmem>>, vector<1x2048xf32>
    tpu.vector_store %arg2[%c0_1, %c0_2], %6 {strides = array<i32>} : memref<1x2048xf32, #tpu.memory_space<vmem>>, vector<1x2048xf32>,
    return
  }
  func.func @transform_0(%arg0: i32) -> (i32, i32) {
    %c0_i32 = arith.constant 0 : i32
    %c0_i32_0 = arith.constant 0 : i32
    return %arg0, %c0_i32 : i32, i32
  }
  func.func @transform_1(%arg0: i32) -> (i32, i32) {
    %c0_i32 = arith.constant 0 : i32
    %c0_i32_0 = arith.constant 0 : i32
    return %arg0, %c0_i32 : i32, i32
  }
}

</mosaic_0001>

<bundles_post_ra>
// kernel: tpu_custom_call.1
= control target key start
LH: loop header
LB: loop body
LE: loop exit
PB: predicated region body
PF: predicated region fallthrough
CT: control target
= control target key end

     0   :  { %6 = vsyncpa [#allocation3], 0  ;;  %s150_s0 = inlined_call_operand.hbm [shape: f32[1,2048], index: 0, kind: input, shape index: {}]   ;;  %s151_s1 = inlined_call_operand.hbm [shape: f32[1,2048], index: 1, kind: output, shape index: {}]  }
   0x1   :  { %7 = vsyncpa [#allocation4], 0  ;;  %s114_s6 = smov [#allocation2]   ;;  %s66_s10 = scalar_lea.hbm %s150_s0, 256 }
   0x2   :  { %s14_s7 = sshll.u32 %s114_s6, 4  ;;  %p67_p0 = scmp.ne.s32.totalorder %s150_s0, %s66_s10  ;;  %s15_s7 = int_to_ptr.vmem [resolvable:$true] %s14_s7 }
   0x3   :  { %p70_p1 = scmp.lt.u32.totalorder %s66_s10, %s150_s0 }
   0x5   :  { %p72_p2 = pnand %p70_p1, %p67_p0 }
   0x7   :  { %75 = shalt.err (!%p72_p2)
}
   0x8   :  { %s76_s15 = scalar_lea.vmem %s15_s7, 256  ;;  %p81_p4 = scmp.lt.s32.totalorder %s15_s7, %s15_s7 }
   0x9   :  { %p77_p3 = scmp.ne.s32.totalorder %s15_s7, %s76_s15  ;;  %p82_p5 = scmp.lt.s32.totalorder %s76_s15, %s76_s15 }
   0xb   :  { %p83_p6 = por %p82_p5, %p81_p4 }
   0xd   :  { %p84_p7 = pnand %p83_p6, %p77_p3 }
   0xf   :  { %87 = shalt.err (!%p84_p7)
}
  0x10   :  { %17 = dma.hbm_to_vmem [thread:$0]  %s150_s0, 256, %s15_s7, [#allocation3]  }
  0x11   :  { %110 = dma.done.wait [#allocation3], 256  }
  0x12   :  { %111 = vsyncadd [#allocation3], 4294967040  ;;  %v21_v0 = vld [vmem:[#allocation2] sm:$0xff]  ;;  %v22_v1 = vld [vmem:[#allocation2 + $0x8] sm:$0xff]  ;;  %s115_s18 = smov [#allocation5]  }
  0x13   :  { %v54_v2 = vmul.f32 -1.442695, %v21_v0  ;;  %v55_v3 = vmul.f32 -1.442695, %v22_v1  ;;  %s45_s19 = sshll.u32 %s115_s18, 4  ;;  %s46_s19 = int_to_ptr.vmem [resolvable:$true] %s45_s19 }
  0x14   :  { %s88_s0 = scalar_lea.vmem %s46_s19, 256  ;;  %p93_p9 = scmp.lt.s32.totalorder %s46_s19, %s46_s19 }
  0x15   :  { %58 = vpow2.f32 %v54_v2  ;;  %p89_p8 = scmp.ne.s32.totalorder %s46_s19, %s88_s0  ;;  %p94_p10 = scmp.lt.s32.totalorder %s88_s0, %s88_s0 }
  0x16   :  { %60 = vpow2.f32 %v55_v3 }
  0x17   :  { %p95_p11 = por %p94_p10, %p93_p9 }
  0x19   :  { %p96_p12 = pnand %p95_p11, %p89_p8 }
  0x1f   :  { %v59_v4 = vpop.eup %58 }
  0x20   :  { %v61_v5 = vpop.eup %60  ;;  %v29_v6 = vadd.f32 1.0, %v59_v4 }
  0x21   :  { %v30_v7 = vadd.f32 1.0, %v61_v5 }
  0x22   :  { %62 = vrcp.f32 %v29_v6 }
  0x23   :  { %64 = vrcp.f32 %v30_v7 }
  0x2c   :  { %v63_v8 = vpop.eup %62 }
  0x2d   :  { %v65_v9 = vpop.eup %64  ;;  %v35_v10 = vmul.f32 %v63_v8, %v21_v0 }
  0x2e   :  { %v36_v11 = vmul.f32 %v65_v9, %v22_v1 }
  0x2f   :  { %37 = vst [vmem:[#allocation5] sm:$0xff] %v35_v10 }
  0x30   :  { %38 = vst [vmem:[#allocation5 + $0x8] sm:$0xff] %v36_v11 }
  0x31   :  { %99 = shalt.err (!%p96_p12)
}
  0x32   :  { %s100_s22 = scalar_lea.hbm %s151_s1, 256 }
  0x33   :  { %p101_p13 = scmp.ne.s32.totalorder %s151_s1, %s100_s22  ;;  %p104_p0 = scmp.lt.u32.totalorder %s100_s22, %s151_s1 }
  0x35   :  { %p106_p1 = pnand %p104_p0, %p101_p13 }
  0x37   :  { %109 = shalt.err (!%p106_p1)
}
  0x38   :  { %48 = dma.vmem_to_hbm [thread:$0]  %s46_s19, 256, %s151_s1, [#allocation4]  }
  0x39   :  { %112 = dma.done.wait [#allocation4], 256  }
  0x3a   :  { %113 = vsyncadd [#allocation4], 4294967040 }
  0x3b   :  { %52 = vsyncpa [#allocation3], 1 }
  0x3c   :  { %53 = vsyncpa [#allocation4], 1 }

</bundles_post_ra>
